<compile_context>
chip_gen: v5e
topology: v5e:2x2
jax: 0.10.0
libtpu: 0.0.40
codegen_flags: <defaults>
</compile_context>

<pallas_src>
import jax
import jax.numpy as jnp
from jax.experimental import pallas as pl
from jax.experimental.pallas import tpu as pltpu

_NEG = -1e30          # bias value for padded output columns (acts like -inf)
_SUB = 16             # batch-tile granularity (bf16 sublane packing; mult. of 8)
_VMEM_BUDGET = 44 * 1024 * 1024   # headroom under v7x's 64 MiB physical VMEM
_VMEM_LIMIT_CAP = 56 * 1024 * 1024


def _round_up(n, m):
    return (n + m - 1) // m * m


# ----------------------------------------------------------------------------
# Pallas kernel: fused  linear (MXU, f32 acc)  +  stable log-softmax
# ----------------------------------------------------------------------------
def _categorical_head_kernel(x_ref, w_ref, b_ref, logp_ref, lse_ref):
    x = x_ref[...]                                   # [TB, Din_p]   compute dtype
    w = w_ref[...]                                   # [Din_p, Dout_p] (VMEM-resident)
    b = b_ref[...]                                   # [1, Dout_p] f32 (padded cols = -1e30)

    # Linear: logits = x @ W + b   (MXU, f32 accumulation)
    logits = jnp.dot(x, w, preferred_element_type=jnp.float32) + b

    # Numerically-stable log-softmax in f32; padded columns carry ~-1e30 so
    # exp underflows to 0 and they do not perturb max / sum.
    m = jnp.max(logits, axis=-1, keepdims=True)
    shifted = logits - m
    e = jnp.exp(shifted)                             # reused for the denominator
    sumexp = jnp.sum(e, axis=-1, keepdims=True)
    log_sumexp = jnp.log(sumexp)

    logp_ref[...] = (shifted - log_sumexp).astype(logp_ref.dtype)
    # Lane-dense lse block (broadcast across 128 lanes -> unmasked full vst).
    lse_ref[...] = jnp.broadcast_to(m + log_sumexp, lse_ref.shape)


def _choose_batch_tile(B, Din_p, Dout_p, x_itemsize, logp_itemsize, batch_tile):
    """Pick TB: VMEM-budgeted, 16-aligned, >=2 (ideally >=4) grid steps."""
    # Fixed VMEM (double-buffer accounting even for the grid-invariant blocks).
    fixed = 2 * Din_p * Dout_p * x_itemsize + 2 * Dout_p * 4
    # Per-batch-row VMEM: x + logp + lse blocks, double buffered.
    per_row = 2 * (Din_p * x_itemsize + Dout_p * logp_itemsize + 128 * 4)
    cap = max(_SUB, (_VMEM_BUDGET - fixed) // per_row)

    tb = min(batch_tile, cap)
    # Prefer >=4 grid steps (hides x-prefetch / logp-writeback); guarantee >=2
    # steps when the batch allows so both v7x TensorCores get work.
    if B >= 4 * _SUB:
        tb = min(tb, pl.cdiv(B, 4))
    elif B >= 2 * _SUB:
        tb = min(tb, pl.cdiv(B, 2))
    tb = min(tb, B)
    tb = max(_SUB, _round_up(tb, _SUB))
    return tb


def categorical_head(x, w_padded, b_padded, d_out, *,
                     logp_dtype=jnp.float32, batch_tile=256):
    """Fused linear + log-softmax head.

    x:        [B, D_in]  float
    w_padded: [Din_p, Dout_p]  pre-padded weight (compute dtype; dims % 128 == 0)
    b_padded: [1, Dout_p] f32  pre-padded bias (padded cols = -1e30)
    d_out:    logical number of classes

    Returns (logp [B, d_out] in logp_dtype, lse [B, 1] f32).
    raw logits = logp + lse;  probs = exp(logp).
    """
    B, D_in = x.shape
    Din_p, Dout_p = w_padded.shape
    compute_dtype = w_padded.dtype
    x_isz = jnp.dtype(compute_dtype).itemsize
    lp_isz = jnp.dtype(logp_dtype).itemsize

    TB = _choose_batch_tile(B, Din_p, Dout_p, x_isz, lp_isz, batch_tile)
    Bp = _round_up(B, TB)
    grid = (Bp // TB,)

    # Fast path: skip the un-fused pad/cast pass over x when already aligned.
    if B == Bp and D_in == Din_p:
        xp = x if x.dtype == compute_dtype else x.astype(compute_dtype)
    else:
        xp = jnp.zeros((Bp, Din_p), compute_dtype).at[:B, :D_in].set(
            x.astype(compute_dtype))

    out_shapes = (
        jax.ShapeDtypeStruct((Bp, Dout_p), logp_dtype),   # normalized log-probs
        jax.ShapeDtypeStruct((Bp, 128), jnp.float32),     # lse (lane-dense; col 0 used)
    )

    # Explicit, shape-derived scoped-VMEM limit (default limits would cap TB).
    vmem_limit = (2 * TB * Din_p * x_isz          # x, double buffered
                  + 2 * TB * Dout_p * lp_isz      # logp, double buffered
                  + 2 * TB * 128 * 4              # lse, double buffered
                  + 2 * Din_p * Dout_p * x_isz    # W (double-buffer accounting)
                  + 2 * Dout_p * 4                # bias
                  + (2 << 20))                    # slack
    vmem_limit = int(min(max(vmem_limit, 4 << 20), _VMEM_LIMIT_CAP))

    logp_pad, lse_pad = pl.pallas_call(
        _categorical_head_kernel,
        out_shape=out_shapes,
        grid=grid,
        in_specs=[
            pl.BlockSpec((TB, Din_p), lambda i: (i, 0)),      # x: tiled over batch
            pl.BlockSpec((Din_p, Dout_p), lambda i: (0, 0)),  # W: grid-invariant / resident
            pl.BlockSpec((1, Dout_p), lambda i: (0, 0)),      # bias: grid-invariant
        ],
        out_specs=(
            pl.BlockSpec((TB, Dout_p), lambda i: (i, 0)),
            pl.BlockSpec((TB, 128), lambda i: (i, 0)),
        ),
        compiler_params=pltpu.CompilerParams(
            dimension_semantics=("parallel",),
            vmem_limit_bytes=vmem_limit),
    )(xp, w_padded, b_padded)

    # Fast path: skip the output-slice pass when already aligned.
    if B == Bp and d_out == Dout_p:
        logp = logp_pad
    else:
        logp = logp_pad[:B, :d_out]
    lse = lse_pad[:B, :1]
    return logp, lse


# ----------------------------------------------------------------------------
# FixedCategorical equivalent (thin plain-JAX wrapper over kernel outputs)
# ----------------------------------------------------------------------------
class FixedCategoricalJax:
    def __init__(self, logp, lse):
        self.logits = logp        # normalized log-probs (what torch caches as .logits)
        self.lse = lse            # [B, 1]; raw linear output = logits + lse

    @property
    def probs(self):
        return jnp.exp(self.logits.astype(jnp.float32))

    @property
    def raw_logits(self):
        return self.logits.astype(jnp.float32) + self.lse

    def sample(self, key):
        # jax.random.categorical is shift-invariant -> sampling from the
        # normalized logits is identical to sampling from the raw ones.
        s = jax.random.categorical(key, self.logits.astype(jnp.float32), axis=-1)
        return s[:, None]

    def log_probs(self, actions):
        # actions: [B, 1] int -> [B, 1] summed log-prob (FixedCategorical.log_probs)
        a = actions.reshape(actions.shape[0], -1)
        lp = jnp.take_along_axis(self.logits.astype(jnp.float32), a, axis=-1)
        return lp.sum(-1, keepdims=True)

    def mode(self):
        return jnp.argmax(self.logits, axis=-1, keepdims=True)


class Categorical2Pallas:
    """Mirror of the PyTorch Categorical2 module.

    Padding + compute-dtype cast of W / bias happen ONCE here, not per call.
    """

    def __init__(self, num_inputs, num_outputs, key, *,
                 compute_dtype=jnp.bfloat16, logp_dtype=jnp.float32):
        # init_: orthogonal_(weight, gain=0.01), constant_(bias, 0)
        w = jax.nn.initializers.orthogonal(scale=0.01)(
            key, (num_outputs, num_inputs), jnp.float32)   # PyTorch layout [D_out, D_in]
        self.weight = jnp.asarray(w)                        # f32 copy (parity / reference)
        self.bias = jnp.zeros((num_outputs,), jnp.float32)

        self.d_in = num_inputs
        self.d_out = num_outputs
        self.logp_dtype = logp_dtype

        din_p = _round_up(num_inputs, 128)
        dout_p = _round_up(num_outputs, 128)
        # Cached, lane-dense, compute-dtype padded parameters.
        self.w_padded = jnp.zeros((din_p, dout_p), compute_dtype).at[
            :num_inputs, :num_outputs].set(self.weight.T.astype(compute_dtype))
        self.b_padded = jnp.full((1, dout_p), _NEG, jnp.float32).at[
            0, :num_outputs].set(self.bias)

    def __call__(self, x):
        logp, lse = categorical_head(x, self.w_padded, self.b_padded, self.d_out,
                                     logp_dtype=self.logp_dtype)
        return FixedCategoricalJax(logp, lse)


if __name__ == "__main__":
    key = jax.random.PRNGKey(0)
    k_param, k_x, k_sample = jax.random.split(key, 3)

    B, D_in, D_out = 8, 32, 16
    module = Categorical2Pallas(D_in, D_out, k_param)
    x = jax.random.normal(k_x, (B, D_in), jnp.float32)

    dist = module(x)
    jax.block_until_ready((dist.logits, dist.lse))

    # exercise the distribution methods once
    a = dist.mode()
    lp = dist.log_probs(a)
    s = dist.sample(k_sample)
    probs = dist.probs
    raw = dist.raw_logits
    jax.block_until_ready((a, lp, s, probs, raw))

    # sanity: probs rows sum to 1 (padded columns were masked inside the kernel)
    assert jnp.allclose(jnp.sum(probs, axis=-1), 1.0, atol=1e-5)
    assert a.shape == (B, 1) and lp.shape == (B, 1) and s.shape == (B, 1)

    # parity vs. the f32 PyTorch-style reference (bf16 matmul -> loose tol)
    logits_ref = x @ module.weight.T + module.bias
    logp_ref = jax.nn.log_softmax(logits_ref, axis=-1)
    assert jnp.allclose(dist.logits.astype(jnp.float32), logp_ref, atol=3e-2)
    assert jnp.allclose(raw, logits_ref, atol=3e-2)

    print("KERNEL_OK")
</pallas_src>

<mosaic_0001>
module attributes {stable_mosaic.version = 11 : i64} {
  func.func @_categorical_head_kernel(%arg0: i32, %arg1: memref<16x128xbf16, #tpu.memory_space<vmem>>, %arg2: memref<128x128xbf16, #tpu.memory_space<vmem>>, %arg3: memref<1x128xf32, #tpu.memory_space<vmem>>, %arg4: memref<16x128xf32, #tpu.memory_space<vmem>>, %arg5: memref<16x128xf32, #tpu.memory_space<vmem>>) attributes {dimension_semantics = [#tpu.dimension_semantics<parallel>], iteration_bounds = array<i64: 1>, scalar_prefetch = 0 : i64, scratch_operands = 0 : i64, tpu.core_type = #tpu.core_type<tc>, window_params = [{transform_indices = @transform_0, window_bounds = array<i64: 16, 128>}, {pipeline_mode = #tpu.pipeline_mode<synchronous>, transform_indices = @transform_1, window_bounds = array<i64: 128, 128>}, {pipeline_mode = #tpu.pipeline_mode<synchronous>, transform_indices = @transform_2, window_bounds = array<i64: 1, 128>}, {transform_indices = @transform_3, window_bounds = array<i64: 16, 128>}, {transform_indices = @transform_4, window_bounds = array<i64: 16, 128>}]} {
    %c0 = arith.constant 0 : index
    %c0_0 = arith.constant 0 : index
    %0 = vector.load %arg1[%c0, %c0_0] : memref<16x128xbf16, #tpu.memory_space<vmem>>, vector<16x128xbf16>
    %c0_1 = arith.constant 0 : index
    %c0_2 = arith.constant 0 : index
    %1 = vector.load %arg2[%c0_1, %c0_2] : memref<128x128xbf16, #tpu.memory_space<vmem>>, vector<128x128xbf16>
    %c0_3 = arith.constant 0 : index
    %c0_4 = arith.constant 0 : index
    %2 = vector.load %arg3[%c0_3, %c0_4] : memref<1x128xf32, #tpu.memory_space<vmem>>, vector<1x128xf32>
    %cst = arith.constant dense<0.000000e+00> : vector<16x128xf32>
    %3 = tpu.matmul %0, %1, %cst {dimension_numbers = #tpu.dot_dimension_numbers<[1], [0], [0], [1], [0, 0, 1, 1], [], []>} : vector<16x128xbf16>, vector<128x128xbf16>, vector<16x128xf32> -> vector<16x128xf32>
    %4 = vector.broadcast %2 : vector<1x128xf32> to vector<16x128xf32>
    %5 = arith.addf %3, %4 : vector<16x128xf32>
    %cst_5 = arith.constant dense<0xFF800000> : vector<16xf32>
    %6 = vector.multi_reduction <maximumf>, %5, %cst_5 [1] : vector<16x128xf32> to vector<16xf32>
    %7 = vector.shape_cast %6 : vector<16xf32> to vector<16x1xf32>
    %8 = vector.broadcast %7 : vector<16x1xf32> to vector<16x128xf32>
    %9 = arith.subf %5, %8 : vector<16x128xf32>
    %10 = math.exp %9 : vector<16x128xf32>
    %cst_6 = arith.constant dense<0.000000e+00> : vector<16xf32>
    %11 = vector.multi_reduction <add>, %10, %cst_6 [1] : vector<16x128xf32> to vector<16xf32>
    %12 = vector.shape_cast %11 : vector<16xf32> to vector<16x1xf32>
    %13 = math.log %12 : vector<16x1xf32>
    %14 = vector.broadcast %13 : vector<16x1xf32> to vector<16x128xf32>
    %15 = arith.subf %9, %14 : vector<16x128xf32>
    %c0_7 = arith.constant 0 : index
    %c0_8 = arith.constant 0 : index
    %16 = vector.load %arg4[%c0_7, %c0_8] : memref<16x128xf32, #tpu.memory_space<vmem>>, vector<16x128xf32>
    tpu.vector_store %arg4[%c0_7, %c0_8], %15 {strides = array<i32>} : memref<16x128xf32, #tpu.memory_space<vmem>>, vector<16x128xf32>,
    %17 = arith.addf %7, %13 : vector<16x1xf32>
    %18 = vector.shape_cast %17 : vector<16x1xf32> to vector<16x1xf32>
    %19 = vector.broadcast %18 : vector<16x1xf32> to vector<16x128xf32>
    %c0_9 = arith.constant 0 : index
    %c0_10 = arith.constant 0 : index
    %20 = vector.load %arg5[%c0_9, %c0_10] : memref<16x128xf32, #tpu.memory_space<vmem>>, vector<16x128xf32>
    tpu.vector_store %arg5[%c0_9, %c0_10], %19 {strides = array<i32>} : memref<16x128xf32, #tpu.memory_space<vmem>>, vector<16x128xf32>,
    return
  }
  func.func @transform_0(%arg0: i32) -> (i32, i32) {
    %c0_i32 = arith.constant 0 : i32
    %c0_i32_0 = arith.constant 0 : i32
    return %arg0, %c0_i32 : i32, i32
  }
  func.func @transform_1(%arg0: i32) -> (i32, i32) {
    %c0_i32 = arith.constant 0 : i32
    %c0_i32_0 = arith.constant 0 : i32
    %c0_i32_1 = arith.constant 0 : i32
    return %c0_i32, %c0_i32_0 : i32, i32
  }
  func.func @transform_2(%arg0: i32) -> (i32, i32) {
    %c0_i32 = arith.constant 0 : i32
    %c0_i32_0 = arith.constant 0 : i32
    %c0_i32_1 = arith.constant 0 : i32
    return %c0_i32, %c0_i32_0 : i32, i32
  }
  func.func @transform_3(%arg0: i32) -> (i32, i32) {
    %c0_i32 = arith.constant 0 : i32
    %c0_i32_0 = arith.constant 0 : i32
    return %arg0, %c0_i32 : i32, i32
  }
  func.func @transform_4(%arg0: i32) -> (i32, i32) {
    %c0_i32 = arith.constant 0 : i32
    %c0_i32_0 = arith.constant 0 : i32
    return %arg0, %c0_i32 : i32, i32
  }
}

</mosaic_0001>

<bundles_post_ra>
// kernel: tpu_custom_call.1
= control target key start
LH: loop header
LB: loop body
LE: loop exit
PB: predicated region body
PF: predicated region fallthrough
CT: control target
= control target key end

     0   :  { %10 = vsyncpa [#allocation3], 0  ;;  %s418_s0 = inlined_call_operand.hbm [shape: bf16[16,128], index: 0, kind: input, shape index: {}]   ;;  %s419_s1 = inlined_call_operand.hbm [shape: bf16[128,128], index: 1, kind: input, shape index: {}]   ;;  %s420_s2 = inlined_call_operand.vmem [shape: f32[1,128], index: 2, kind: input, shape index: {}]   ;;  %s421_s3 = inlined_call_operand.hbm [shape: f32[16,128], index: 3, kind: output, shape index: {0}]   ;;  %s422_s4 = inlined_call_operand.hbm [shape: f32[16,128], index: 4, kind: output, shape index: {1}]  }
   0x1   :  { %11 = vsyncpa [#allocation6], 0 }
   0x2   :  { %12 = vsyncpa [#allocation4], 0 }
   0x3   :  { %13 = vsyncpa [#allocation9], 0  ;;  %s18_s17 = sshll.u32 %s418_s0, 4  ;;  %s370_s18 = smov [#allocation2]   ;;  %s19_s17 = int_to_ptr.hbm [resolvable:$true] %s18_s17 }
   0x4   :  { %s20_s19 = sshll.u32 %s370_s18, 4  ;;  %s31_s22 = sshll.u32 %s419_s1, 4  ;;  %s21_s19 = int_to_ptr.vmem [resolvable:$true] %s20_s19  ;;  %s32_s22 = int_to_ptr.hbm [resolvable:$true] %s31_s22 }
   0x5   :  { %s371_s23 = smov 64   ;;  %s372_s24 = smov 4  }
   0x6   :  { %26 = dma.hbm_to_vmem [thread:$0]  %s19_s17, 128, %s21_s19, [#allocation3], %s371_s23, %s371_s23, %s372_s24  }
   0x7   :  { %s373_s25 = smov [#allocation5]  }
   0x8   :  { %s33_s26 = sshll.u32 %s373_s25, 4  ;;  %s34_s26 = int_to_ptr.vmem [resolvable:$true] %s33_s26 }
   0x9   :  { %39 = dma.hbm_to_vmem [thread:$0]  %s32_s22, 1024, %s34_s26, [#allocation6], %s371_s23, %s371_s23, %s372_s24  }
   0xa   :  { %362 = dma.done.wait [#allocation3], 128  }
   0xb   :  { %363 = vsyncadd [#allocation3], 4294967168 }
   0xc   :  { %364 = dma.done.wait [#allocation6], 1024  }
   0xd   :  { %365 = vsyncadd [#allocation6], 4294966272  ;;  %v248_v0 = vld [vmem:[#allocation5 + $0x38] sm:$0xff]  ;;  %v247_v1 = vld [vmem:[#allocation5 + $0x30] sm:$0xff]  ;;  %s172_s30 = sshll.u32 %s421_s3, 4  ;;  %s375_s5 = smov [#allocation8]   ;;  %s173_s30 = int_to_ptr.hbm [resolvable:$true] %s172_s30 }
   0xe   :  { %126 = vmatpush.bf16.msra.mxu0 %v248_v0  ;;  %v246_v2 = vld [vmem:[#allocation5 + $0x28] sm:$0xff]  ;;  %v245_v3 = vld [vmem:[#allocation5 + $0x20] sm:$0xff]  ;;  %v244_v4 = vld [vmem:[#allocation5 + $0x18] sm:$0xff]  ;;  %s183_s6 = sshll.u32 %s375_s5, 4  ;;  %s185_s9 = sshll.u32 %s422_s4, 4  ;;  %s184_s6 = int_to_ptr.vmem [resolvable:$true] %s183_s6  ;;  %s186_s9 = int_to_ptr.hbm [resolvable:$true] %s185_s9 }
   0xf   :  { %v243_v5 = vld [vmem:[#allocation5 + $0x10] sm:$0xff]  ;;  %v242_v6 = vld [vmem:[#allocation5 + $0x8] sm:$0xff]  ;;  %v241_v7 = vld [vmem:[#allocation5] sm:$0xff]  ;;  %s376_s10 = smov 128   ;;  %s377_s11 = smov 8  }
  0x10   :  { %v240_v8 = vld [vmem:[#allocation2] sm:$0xff] }
  0x11   :  { %v257_v9 = vld [vmem:[%s420_s2] ss:$0 sm:$0xff]  ;;  %s374_s2 = smov [#allocation7]  }
  0x12   :  { %127 = vmatpush.bf16.msra.mxu0 %v247_v1  ;;  %s170_s27 = sshll.u32 %s374_s2, 4  ;;  %s171_s27 = int_to_ptr.vmem [resolvable:$true] %s170_s27 }
  0x16   :  { %128 = vmatpush.bf16.msra.mxu0 %v246_v2 }
  0x1a   :  { %129 = vmatpush.bf16.msra.mxu0 %v245_v3 }
  0x1e   :  { %130 = vmatpush.bf16.msra.mxu0 %v244_v4 }
  0x22   :  { %131 = vmatpush.bf16.msra.mxu0 %v243_v5 }
  0x26   :  { %132 = vmatpush.bf16.msra.mxu0 %v242_v6 }
  0x2a   :  { %133 = vmatpush.bf16.msra.mxu0 %v241_v7 }
  0x2d   :  { %134 = vmatmul.bf16.vlgmr.msra.gmra.mxu0 %v240_v8 }
  0xaa   :  { %v135_v10 = vpop.f32.mrf.mxu0 }
  0xab   :  { %v136_v11 = vadd.f32 %v257_v9, %v135_v10 }
  0xad   :  { %140 = vmax.xlane.f32.xlu0 %v136_v11 }
  0xb2   :  { %v137_v12 = vpop.f32.mrf.mxu0 }
  0xb3   :  { %v138_v13 = vadd.f32 %v257_v9, %v137_v12 }
  0xb5   :  { %142 = vmax.xlane.f32.xlu0 %v138_v13 }
 0x120   :  { %v141_v14 = vpop.xlane.xlu0 %140 }
 0x121   :  { %v144_v15 = vsub.f32 %v136_v11, %v141_v14 }
 0x123   :  { %v146_v16 = vmul.f32 1.442695, %v144_v15 }
 0x125   :  { %258 = vpow2.f32 %v146_v16 }
 0x128   :  { %v143_v17 = vpop.xlane.xlu0 %142 }
 0x129   :  { %v145_v18 = vsub.f32 %v138_v13, %v143_v17 }
 0x12b   :  { %v259_v19 = vpop.eup %258  ;;  %v148_v20 = vmul.f32 1.442695, %v145_v18 }
 0x12c   :  { %150 = vadd.xlane.f32.xlu1 %v259_v19 }
 0x12d   :  { %260 = vpow2.f32 %v148_v20 }
 0x133   :  { %v261_v21 = vpop.eup %260 }
 0x134   :  { %152 = vadd.xlane.f32.xlu1 %v261_v21 }
 0x19f   :  { %v151_v22 = vpop.xlane.xlu1 %150 }
 0x1a0   :  { %262 = vlog2.f32 %v151_v22 }
 0x1a6   :  { %v263_v23 = vpop.eup %262 }
 0x1a7   :  { %v155_v24 = vmul.f32 0.6931472, %v263_v23  ;;  %v153_v25 = vpop.xlane.xlu1 %152 }
 0x1a8   :  { %264 = vlog2.f32 %v153_v25 }
 0x1a9   :  { %v158_v26 = vsub.f32 %v144_v15, %v155_v24  ;;  %v162_v27 = vadd.f32 %v155_v24, %v141_v14 }
 0x1ab   :  { %160 = vst [vmem:[#allocation7] sm:$0xff] %v158_v26 }
 0x1ac   :  { %164 = vst [vmem:[#allocation8] sm:$0xff] %v162_v27 }
 0x1ae   :  { %v265_v28 = vpop.eup %264 }
 0x1af   :  { %v157_v29 = vmul.f32 0.6931472, %v265_v28 }
 0x1b1   :  { %v159_v30 = vsub.f32 %v145_v18, %v157_v29  ;;  %v163_v31 = vadd.f32 %v157_v29, %v143_v17 }
 0x1b3   :  { %161 = vst [vmem:[#allocation7 + $0x8] sm:$0xff] %v159_v30 }
 0x1b4   :  { %165 = vst [vmem:[#allocation8 + $0x8] sm:$0xff] %v163_v31  ;;  %178 = dma.vmem_to_hbm [thread:$0]  %s171_s27, 256, %s173_s30, [#allocation4], %s376_s10, %s376_s10, %s377_s11  }
 0x1b5   :  { %191 = dma.vmem_to_hbm [thread:$0]  %s184_s6, 256, %s186_s9, [#allocation9], %s376_s10, %s376_s10, %s377_s11  }
 0x1b6   :  { %366 = dma.done.wait [#allocation4], 256  }
 0x1b7   :  { %367 = vsyncadd [#allocation4], 4294967040 }
 0x1b8   :  { %368 = dma.done.wait [#allocation9], 256  }
 0x1b9   :  { %369 = vsyncadd [#allocation9], 4294967040 }
 0x1ba   :  { %200 = vsyncpa [#allocation3], 1 }
 0x1bb   :  { %201 = vsyncpa [#allocation6], 1 }
 0x1bc   :  { %202 = vsyncpa [#allocation4], 1 }
 0x1bd   :  { %203 = vsyncpa [#allocation9], 1 }

</bundles_post_ra>
